<compile_context>
chip_gen: v6e
topology: v6e:2x2x1
jax: 0.10.0
libtpu: 0.0.40
codegen_flags: <defaults>
</compile_context>

<pallas_src>
import math

import numpy as np
import jax
import jax.numpy as jnp
from jax.experimental import pallas as pl
from jax.experimental.pallas import tpu as pltpu


def _kernel_small_dim(dim: int):
    """Batch-on-lanes layout: t (1, TB) * freqs (dim, 1) -> out (dim, TB)."""
    half_dim = dim // 2

    def kernel(t_ref, f_ref, o_ref):
        t = t_ref[...]                                        # (1, TB)
        f = f_ref[...]                                        # (dim, 1), halves duplicated
        args = f * t                                          # (dim, TB), lane-dense
        row = jax.lax.broadcasted_iota(jnp.int32, (dim, 1), 0)
        out = jnp.where(row >= half_dim, jnp.cos(args), jnp.sin(args))
        o_ref[...] = out.astype(o_ref.dtype)                  # single lane-dense store

    return kernel


def _kernel_split(dim: int):
    """Row-major layout, two half-width stores (requires half_dim % 128 == 0)."""
    half_dim = dim // 2

    def kernel(t_ref, f_ref, o_ref):
        t = t_ref[...]                                        # (TB, 1)
        fh = f_ref[...]                                       # (1, half_dim)
        args = t * fh                                         # (TB, half_dim)
        o_ref[:, :half_dim] = jnp.sin(args).astype(o_ref.dtype)   # lane-aligned
        o_ref[:, half_dim:] = jnp.cos(args).astype(o_ref.dtype)   # lane-aligned

    return kernel


def _kernel_select(dim: int):
    """Row-major layout, duplicated freqs + per-column select (single store)."""
    half_dim = dim // 2

    def kernel(t_ref, f_ref, o_ref):
        t = t_ref[...]                                        # (TB, 1)
        f = f_ref[...]                                        # (1, dim)
        args = t * f                                          # (TB, dim)
        col = jax.lax.broadcasted_iota(jnp.int32, (1, dim), 1)
        out = jnp.where(col >= half_dim, jnp.cos(args), jnp.sin(args))
        o_ref[...] = out.astype(o_ref.dtype)

    return kernel


def sinusoidal_position_embeddings(time: jax.Array, dim: int, *,
                                   block_b: int = 2048,
                                   out_dtype=jnp.float32) -> jax.Array:
    """Pallas implementation of SinusoidalPositionEmbeddings.forward.

    time: (B,) float array of diffusion timesteps. Returns (B, dim),
    matching torch.cat((sin(t*f), cos(t*f)), dim=-1) with
    f_k = exp(-k * log(10000) / (dim//2 - 1)).
    """
    assert dim % 2 == 0, "dim must be even"
    assert dim >= 4, "dim must be >= 4 (half_dim - 1 would be zero otherwise)"
    B = time.shape[0]
    half_dim = dim // 2

    # Frequency table as a numpy literal constant — zero runtime cost.
    scale = math.log(10000.0) / (half_dim - 1)
    freqs_half = np.exp(np.arange(half_dim, dtype=np.float32) * -scale).astype(np.float32)

    params = pltpu.CompilerParams(dimension_semantics=("parallel",))

    if dim < 128:
        # --- lane-dense small-dim path: batch on the lane axis ---------------
        freqs = jnp.asarray(np.concatenate([freqs_half, freqs_half]).reshape(dim, 1))
        t_row = time.astype(jnp.float32).reshape(1, B)
        if B <= block_b:
            tb, grid = B, (1,)
        else:
            tb = max(128, (block_b // 128) * 128)             # lane tile: mult of 128
            grid = (pl.cdiv(B, tb),)                          # ragged last tile masked
        out_t = pl.pallas_call(
            _kernel_small_dim(dim),
            out_shape=jax.ShapeDtypeStruct((dim, B), out_dtype),
            grid=grid,
            in_specs=[
                pl.BlockSpec((1, tb), lambda i: (0, i)),      # timesteps (lane vector)
                pl.BlockSpec((dim, 1), lambda i: (0, 0)),     # shared freq column
            ],
            out_specs=pl.BlockSpec((dim, tb), lambda i: (0, i)),
            compiler_params=params,
            cost_estimate=pl.CostEstimate(
                flops=2 * B * dim,
                transcendentals=2 * B * dim,
                bytes_accessed=4 * (B + dim + B * dim)),
        )(t_row, freqs)
        # Module semantics are (B, dim); the lane-dense (dim, B) slab is tiny
        # at these dims.  TODO(synk): consume (dim, B) directly in a fused
        # downstream time-MLP kernel and drop this transpose.
        return out_t.T

    # --- row-major wide-dim path --------------------------------------------
    t_col = time.astype(jnp.float32).reshape(B, 1)
    if B <= block_b:
        tb, grid = B, (1,)
    else:
        tb = max(8, (block_b // 8) * 8)                       # sublane tile: mult of 8
        grid = (pl.cdiv(B, tb),)                              # ragged last tile masked

    if half_dim % 128 == 0:
        kernel = _kernel_split(dim)
        freqs = jnp.asarray(freqs_half.reshape(1, half_dim))
        transcendentals = B * dim
    else:
        kernel = _kernel_select(dim)
        freqs = jnp.asarray(np.concatenate([freqs_half, freqs_half]).reshape(1, dim))
        transcendentals = 2 * B * dim

    return pl.pallas_call(
        kernel,
        out_shape=jax.ShapeDtypeStruct((B, dim), out_dtype),
        grid=grid,
        in_specs=[
            pl.BlockSpec((tb, 1), lambda i: (i, 0)),          # timesteps tile
            pl.BlockSpec(freqs.shape, lambda i: (0, 0)),      # shared freq table
        ],
        out_specs=pl.BlockSpec((tb, dim), lambda i: (i, 0)),
        compiler_params=params,
        cost_estimate=pl.CostEstimate(
            flops=2 * B * dim,
            transcendentals=transcendentals,
            bytes_accessed=4 * (B + dim + B * dim)),
    )(t_col, freqs)


def _reference(time: jax.Array, dim: int) -> jax.Array:
    half_dim = dim // 2
    emb = math.log(10000.0) / (half_dim - 1)
    emb = jnp.exp(jnp.arange(half_dim, dtype=jnp.float32) * -emb)
    emb = time.astype(jnp.float32)[:, None] * emb[None, :]
    return jnp.concatenate([jnp.sin(emb), jnp.cos(emb)], axis=-1)


if __name__ == "__main__":
    key = jax.random.PRNGKey(0)
    k1, k2, k3 = jax.random.split(key, 3)

    # Case 1: the Model's shapes (time_embed_dim=6), small image batch.
    B1, dim1 = 8, 6
    t1 = jax.random.uniform(k1, (B1,), minval=0.0, maxval=1000.0, dtype=jnp.float32)
    out1 = jax.block_until_ready(sinusoidal_position_embeddings(t1, dim1))
    ref1 = _reference(t1, dim1)
    assert out1.shape == (B1, dim1), out1.shape
    assert jnp.allclose(out1, ref1, atol=1e-5, rtol=1e-5), (
        float(jnp.max(jnp.abs(out1 - ref1))))

    # Case 2: large batch, tiny dim -> tiled lane-dense path with a ragged
    # (masked) final lane tile (3000 = 2048 + 952).
    B2, dim2 = 3000, 6
    t2 = jax.random.uniform(k2, (B2,), minval=0.0, maxval=1000.0, dtype=jnp.float32)
    out2 = jax.block_until_ready(sinusoidal_position_embeddings(t2, dim2))
    ref2 = _reference(t2, dim2)
    assert out2.shape == (B2, dim2), out2.shape
    assert jnp.allclose(out2, ref2, atol=1e-4, rtol=1e-4), (
        float(jnp.max(jnp.abs(out2 - ref2))))

    # Case 3: wide dim -> row-major path with split half-width sin/cos stores.
    B3, dim3 = 64, 256
    t3 = jax.random.uniform(k3, (B3,), minval=0.0, maxval=1000.0, dtype=jnp.float32)
    out3 = jax.block_until_ready(sinusoidal_position_embeddings(t3, dim3))
    ref3 = _reference(t3, dim3)
    assert out3.shape == (B3, dim3), out3.shape
    assert jnp.allclose(out3, ref3, atol=1e-4, rtol=1e-4), (
        float(jnp.max(jnp.abs(out3 - ref3))))

    print("KERNEL_OK")
</pallas_src>

<mosaic_0001>
module attributes {stable_mosaic.version = 11 : i64} {
  func.func @kernel(%arg0: i32, %arg1: memref<1x8xf32, #tpu.memory_space<vmem>>, %arg2: memref<6x1xf32, #tpu.memory_space<vmem>>, %arg3: memref<6x8xf32, #tpu.memory_space<vmem>>) attributes {dimension_semantics = [#tpu.dimension_semantics<parallel>], iteration_bounds = array<i64: 1>, scalar_prefetch = 0 : i64, scratch_operands = 0 : i64, tpu.core_type = #tpu.core_type<tc>, window_params = [{transform_indices = @transform_0, window_bounds = array<i64: 1, 8>}, {pipeline_mode = #tpu.pipeline_mode<synchronous>, transform_indices = @transform_1, window_bounds = array<i64: 6, 1>}, {transform_indices = @transform_2, window_bounds = array<i64: 6, 8>}]} {
    %c0 = arith.constant 0 : index
    %c0_0 = arith.constant 0 : index
    %0 = vector.load %arg1[%c0, %c0_0] : memref<1x8xf32, #tpu.memory_space<vmem>>, vector<1x8xf32>
    %c0_1 = arith.constant 0 : index
    %c0_2 = arith.constant 0 : index
    %1 = vector.load %arg2[%c0_1, %c0_2] : memref<6x1xf32, #tpu.memory_space<vmem>>, vector<6x1xf32>
    %2 = vector.broadcast %1 : vector<6x1xf32> to vector<6x8xf32>
    %3 = vector.broadcast %0 : vector<1x8xf32> to vector<6x8xf32>
    %4 = arith.mulf %2, %3 : vector<6x8xf32>
    %5 = tpu.iota {dimensions = array<i32: 0>} : vector<6x1xi32>
    %c3_i32 = arith.constant 3 : i32
    %6 = vector.broadcast %c3_i32 : i32 to vector<6x1xi32>
    %7 = arith.cmpi sge, %5, %6 : vector<6x1xi32>
    %8 = math.cos %4 : vector<6x8xf32>
    %9 = math.sin %4 : vector<6x8xf32>
    %10 = vector.shape_cast %7 : vector<6x1xi1> to vector<6x1xi1>
    %11 = vector.broadcast %10 : vector<6x1xi1> to vector<6x8xi1>
    %12 = arith.select %11, %8, %9 : vector<6x8xi1>, vector<6x8xf32>
    %c0_3 = arith.constant 0 : index
    %c0_4 = arith.constant 0 : index
    %13 = vector.load %arg3[%c0_3, %c0_4] : memref<6x8xf32, #tpu.memory_space<vmem>>, vector<6x8xf32>
    tpu.vector_store %arg3[%c0_3, %c0_4], %12 {strides = array<i32>} : memref<6x8xf32, #tpu.memory_space<vmem>>, vector<6x8xf32>,
    return
  }
  func.func @transform_0(%arg0: i32) -> (i32, i32) {
    %c0_i32 = arith.constant 0 : i32
    %c0_i32_0 = arith.constant 0 : i32
    return %c0_i32, %arg0 : i32, i32
  }
  func.func @transform_1(%arg0: i32) -> (i32, i32) {
    %c0_i32 = arith.constant 0 : i32
    %c0_i32_0 = arith.constant 0 : i32
    %c0_i32_1 = arith.constant 0 : i32
    return %c0_i32, %c0_i32_0 : i32, i32
  }
  func.func @transform_2(%arg0: i32) -> (i32, i32) {
    %c0_i32 = arith.constant 0 : i32
    %c0_i32_0 = arith.constant 0 : i32
    return %c0_i32, %arg0 : i32, i32
  }
}

</mosaic_0001>

<bundles_post_ra>
// kernel: tpu_custom_call.1
= control target key start
LH: loop header
LB: loop body
LE: loop exit
PB: predicated region body
PF: predicated region fallthrough
CT: control target
= control target key end

     0   :  { %v303_v1 = vmov 0   ;;  %s357_s0 = inlined_call_operand.vmem [shape: f32[1,8], index: 0, kind: input, shape index: {}]   ;;  %s358_s1 = inlined_call_operand.vmem [shape: f32[6,1], index: 1, kind: input, shape index: {}]   ;;  %s359_s2 = inlined_call_operand.hbm [shape: f32[6,8], index: 2, kind: output, shape index: {}]  }
   0x1   :  { %v13_v0 = vld [vmem:[%s358_s1] sm:$0x3f]  ;;  %276 = vset.pattern.permute.xlu0 %v303_v1 }
   0x2   :  { %16 = vperm.xlu0 %276, %v13_v0  }
   0x3   :  { %7 = vsyncpa [#allocation3], 0  ;;  %v255_v2 = vld [vmem:[%s357_s0] ss:$0 sm:$0xff]  ;;  %v304_v15 = vmov 683565275  }
   0x4   :  { %v305_v17 = vmov 2475754826   ;;  %v306_v20 = vmov 2131351028   ;;  %v307_v23 = vmov 2102212464  }
   0x5   :  { %v308_v26 = vmov 920167782   ;;  %v309_v29 = vmov 1326507024   ;;  %s310_s0 = smov [#allocation2]  }
   0x6   :  { %s247_s1 = sshll.u32 %s310_s0, 4  ;;  %s248_s1 = int_to_ptr.vmem [resolvable:$true] %s247_s1 }
   0x7   :  { %s281_s13 = scalar_lea.vmem %s248_s1, 128  ;;  %p286_p1 = scmp.lt.s32.totalorder %s248_s1, %s248_s1 }
   0x8   :  { %p282_p0 = scmp.ne.s32.totalorder %s248_s1, %s281_s13  ;;  %p287_p2 = scmp.lt.s32.totalorder %s281_s13, %s281_s13 }
   0xa   :  { %p288_p3 = por %p287_p2, %p286_p1 }
   0xc   :  { %p289_p4 = pnand %p288_p3, %p282_p0 }
  0x7d   :  { %v17_v3 = vpop.permute.xlu0 %16 }
  0x7e   :  { %v332_v4 = vmul.f32 %v255_v2, %v17_v3 }
  0x80   :  { %v32_v5 = vand.u32 2139095040, %v332_v4  ;;  %v29_v9 = vand.u32 2147483647, %v332_v4  ;;  %vm31_vm7 = vcmp.lt.s32.totalorder %v332_v4, 0 }
  0x82   :  { %v33_v6 = vshrl.u32 %v32_v5, 23  ;;  %v36_v12 = vand.u32 8388607, %v29_v9  ;;  %vm30_vm8 = vcmp.le.f32.partialorder %v29_v9, 0.7853982 }
  0x84   :  { %v256_v7 = vadd.s32 4294967169, %v33_v6  ;;  %v37_v31 = vor.u32 8388608, %v36_v12 }
  0x86   :  { %v39_v8 = vadd.s32 1, %v256_v7  ;;  %v77_v45 = vshll.u32 %v37_v31, 8 }
  0x88   :  { %vm40_vm0 = vcmp.gt.s32.totalorder %v39_v8, 0 }
  0x89   :  { %v41_v10 = vsel %vm40_vm0, %v39_v8, 0  ;;  %vm121_vm0 = vweird.f32 %v332_v4 }
  0x8a   :  { %v43_v11 = vand.u32 31, %v41_v10  ;;  %v42_v14 = vshrl.u32 %v41_v10, 5 }
  0x8c   :  { %v44_v13 = vsub.s32 32, %v43_v11  ;;  %v46_v16 = vshll.u32 %v304_v15, %v43_v11  ;;  %v49_v18 = vshll.u32 %v305_v17, %v43_v11  ;;  %v52_v22 = vshll.u32 %v306_v20, %v43_v11 }
  0x8d   :  { %v55_v25 = vshll.u32 %v307_v23, %v43_v11  ;;  %v58_v28 = vshll.u32 %v308_v26, %v43_v11  ;;  %vm61_vm1 = vcmp.lt.s32.totalorder %v42_v14, 1  ;;  %vm64_vm2 = vcmp.lt.s32.totalorder %v42_v14, 4 }
  0x8e   :  { %v47_v19 = vshrl.u32 %v305_v17, %v44_v13  ;;  %v50_v21 = vshrl.u32 %v306_v20, %v44_v13  ;;  %v53_v24 = vshrl.u32 %v307_v23, %v44_v13  ;;  %v56_v27 = vshrl.u32 %v308_v26, %v44_v13 }
  0x8f   :  { %v59_v30 = vshrl.u32 %v309_v29, %v44_v13  ;;  %v45_v40 = vshrl.u32 %v304_v15, %v44_v13  ;;  %vm63_vm3 = vcmp.lt.s32.totalorder %v42_v14, 3  ;;  %vm62_vm4 = vcmp.lt.s32.totalorder %v42_v14, 2 }
  0x90   :  { %v48_v32 = vor.u32 %v47_v19, %v46_v16  ;;  %v51_v33 = vor.u32 %v50_v21, %v49_v18  ;;  %v54_v34 = vor.u32 %v53_v24, %v52_v22  ;;  %v57_v35 = vor.u32 %v56_v27, %v55_v25 }
  0x91   :  { %v60_v36 = vor.u32 %v59_v30, %v58_v28  ;;  %v26_v24 = vlaneseq }
  0x92   :  { %v66_v37 = vsel %vm64_vm2, %v54_v34, 2102212464  ;;  %v69_v38 = vsel %vm61_vm1, %v48_v32, %v51_v33  ;;  %v73_v39 = vsel %vm61_vm1, %v51_v33, %v54_v34  ;;  %v70_v41 = vsel %vm64_vm2, %v57_v35, 920167782 }
  0x93   :  { %v74_v42 = vsel %vm64_vm2, %v60_v36, 1326507024  ;;  %v71_v43 = vsel %vm63_vm3, %v54_v34, %v70_v41  ;;  %v65_v46 = vsel %vm61_vm1, %v45_v40, %v48_v32  ;;  %v67_v47 = vsel %vm63_vm3, %v51_v33, %v66_v37 }
  0x94   :  { %v75_v44 = vsel %vm63_vm3, %v57_v35, %v74_v42  ;;  %v72_v48 = vsel %vm62_vm4, %v69_v38, %v71_v43  ;;  %v68_v54 = vsel %vm62_vm4, %v65_v46, %v67_v47  ;;  %v27_v26 = vshrl.u32 %v26_v24, 7 }
  0x95   :  { %v76_v49 = vsel %vm62_vm4, %v73_v39, %v75_v44  ;;  %v341_v52 = vmul.u32.u64.low %v77_v45, %v72_v48  ;;  %v342_v53 = vmul.u32.u64.high %v77_v45, %v72_v48, %v341_v52  ;;  %v84_v56 = vmul.u32 %v77_v45, %v68_v54 }
  0x96   :  { %v338_v50 = vmul.u32.u64.low %v77_v45, %v76_v49  ;;  %v339_v51 = vmul.u32.u64.high %v77_v45, %v76_v49, %v338_v50  ;;  %vm28_vm9 = vcmp.ge.s32.totalorder %v27_v26, 3  ;;  %vm239_vm1 = vcmask 62464  }
  0x97   :  { %v87_v55 = vadd.s32 1, %v342_v53 }
  0x98   :  { %vm86_vm5 = vc.u32 %v339_v51, %v341_v52  ;;  %v85_v5 = vadd.s32 %v341_v52, %v339_v51 }
  0x99   :  { %v88_v57 = vsel %vm86_vm5, %v87_v55, %v342_v53 }
  0x9a   :  { %v89_v58 = vadd.s32 %v88_v57, %v84_v56 }
  0x9c   :  { %v90_v59 = vadd.s32 536870912, %v89_v58 }
  0x9e   :  { %v91_v60 = vshrl.u32 %v90_v59, 30 }
  0xa0   :  { %v92_v61 = vshll.u32 %v91_v60, 30  ;;  %v115_v19 = vsub.s32 4, %v91_v60 }
  0xa2   :  { %v93_v62 = vsub.s32 %v89_v58, %v92_v61  ;;  %v116_v22 = vsel %vm31_vm7, %v115_v19, %v91_v60 }
  0xa3   :  { %v118_v23 = vsel %vm30_vm8, 0, %v116_v22 }
  0xa4   :  { %v95_v63 = vsub.s32 0, %v93_v62  ;;  %v225_v25 = vadd.s32 3, %v118_v23  ;;  %v122_v27 = vand.u32 3, %v118_v23 }
  0xa6   :  { %v257_v0 = vmin.u32 %v95_v63, %v93_v62  ;;  %v226_v28 = vand.u32 3, %v225_v25  ;;  %vm127_vm10 = vcmp.eq.s32.totalorder %v122_v27, 2  ;;  %vm124_vm12 = vcmp.eq.s32.totalorder %v122_v27, 0 }
  0xa7   :  { %vm123_vm14 = vcmp.lt.s32.totalorder %v122_v27, 2 }
  0xa8   :  { %v97_v1 = vclz %v257_v0  ;;  %vm231_vm11 = vcmp.eq.s32.totalorder %v226_v28, 2  ;;  %vm228_vm13 = vcmp.eq.s32.totalorder %v226_v28, 0  ;;  %vm227_vm15 = vcmp.lt.s32.totalorder %v226_v28, 2 }
  0xaa   :  { %v258_v2 = vadd.s32 4294967294, %v97_v1 }
  0xac   :  { %vm259_vm6 = vcmp.lt.s32.totalorder %v258_v2, 0 }
  0xad   :  { %v100_v3 = vsel %vm259_vm6, 0, %v258_v2 }
  0xae   :  { %v101_v6 = vsub.s32 32, %v100_v3  ;;  %v105_v7 = vsub.s32 4294967266, %v100_v3  ;;  %v102_v8 = vshll.u32 %v93_v62, %v100_v3 }
  0xb0   :  { %v103_v10 = vshrl.u32 %v85_v5, %v101_v6  ;;  %v106_v11 = vadd.s32 127, %v105_v7 }
  0xb2   :  { %v104_v12 = vor.u32 %v103_v10, %v102_v8  ;;  %v107_v13 = vshll.u32 %v106_v11, 23 }
  0xb4   :  { %v108_v14 = vor.u32 4788187, %v107_v13  ;;  %v111_v16 = vcvt.s32.f32 %v104_v12 }
  0xb6   :  { %v109_v15 = vand.u32 2147483647, %v108_v14 }
  0xb8   :  { %v112_v17 = vmul.f32 %v111_v16, %v109_v15 }
  0xba   :  { %v113_v18 = vxor.u32 2147483648, %v112_v17 }
  0xbc   :  { %v114_v20 = vsel %vm31_vm7, %v113_v18, %v112_v17 }
  0xbd   :  { %v117_v21 = vsel %vm30_vm8, %v332_v4, %v114_v20 }
  0xbe   :  { %277 = vcosq.f32 %v117_v21 }
  0xbf   :  { %279 = vsinq.f32 %v117_v21 }
  0xcb   :  { %v278_v29 = vpop.eup %277 }
  0xcc   :  { %v280_v30 = vpop.eup %279  ;;  %v128_v31 = vxor.u32 2147483648, %v278_v29 }
  0xcd   :  { %v125_v32 = vxor.u32 2147483648, %v280_v30 }
  0xce   :  { %v129_v9 = vsel %vm127_vm10, %v128_v31, %v280_v30  ;;  %v233_v33 = vsel %vm231_vm11, %v128_v31, %v280_v30 }
  0xcf   :  { %v126_v34 = vsel %vm124_vm12, %v278_v29, %v125_v32  ;;  %v230_v35 = vsel %vm228_vm13, %v278_v29, %v125_v32 }
  0xd0   :  { %v130_v36 = vsel %vm123_vm14, %v126_v34, %v129_v9  ;;  %v234_v37 = vsel %vm227_vm15, %v230_v35, %v233_v33 }
  0xd1   :  { %v131_v38 = vsel %vm121_vm0, nan, %v130_v36  ;;  %v235_v39 = vsel %vm121_vm0, nan, %v234_v37 }
  0xd2   :  { %v238_v40 = vsel %vm28_vm9, %v131_v38, %v235_v39 }
  0xd3   :  { %240 = vst.msk [vmem:[#allocation2] sm:$0x3f] %vm239_vm1, %v238_v40 }
  0xd4   :  { %292 = shalt.err (!%p289_p4)
}
  0xd5   :  { %250 = dma.vmem_to_hbm [thread:$0]  %s248_s1, 128, %s359_s2, [#allocation3]  }
  0xd6   :  { %301 = dma.done.wait [#allocation3], 128  }
  0xd7   :  { %302 = vsyncadd [#allocation3], 4294967168 }
  0xd8   :  { %254 = vsyncpa [#allocation3], 1 }

</bundles_post_ra>
